<compile_context>
chip_gen: v5e
topology: v5e:2x2
jax: 0.10.0
libtpu: 0.0.40
codegen_flags: <defaults>
</compile_context>

<pallas_src>
import math

import jax
import jax.numpy as jnp
from jax.experimental import pallas as pl
from jax.experimental.pallas import tpu as pltpu


# 48 MiB scoped VMEM: above the v5e 16 MiB / v6e,v7x 32 MiB defaults, comfortably
# below v7x's 64 MiB physical and v5e/v6e's 128 MiB physical.
_VMEM_LIMIT_BYTES = 48 * 1024 * 1024


def _pick_graphs_per_block(G, N, Fin, F2, min_grid_steps=2,
                           vmem_budget=(3 * _VMEM_LIMIT_BYTES) // 4):
    """Largest divisor-of-G graph batch per grid step such that
    (a) the grid keeps >= min_grid_steps parallel steps (v7x has 2 TensorCores) and
    (b) double-buffered bf16 inputs + f32 outputs fit the VMEM budget."""
    bytes_per_graph = (2 * (N * N + N * Fin) * 2        # bf16 A + X, double buffered
                       + 2 * (N * F2 + N) * 4)          # f32 h + score, double buffered
    weight_bytes = 2 * Fin * F2 * 2                     # bf16 weight, double buffered
    best = 1
    for bg in range(1, G + 1):
        if G % bg != 0:
            continue
        steps = G // bg
        if G >= min_grid_steps and steps < min_grid_steps:
            continue
        if bg * bytes_per_graph + weight_bytes <= vmem_budget:
            best = max(best, bg)
    return best


# ----------------------------------------------------------------------------
# Kernel 1: fused GCN / GCNsp block + HGP-SL information score.
#   h      = relu(A_hat @ (X @ [Wm|Wp]))            -> (Bg, N, 2*Fout)
#   score  = sum_f | h - A_hat @ h |                -> (Bg, 1, N)  (lane-dense)
# ----------------------------------------------------------------------------
def _gcn_block_score_kernel(a_ref, x_ref, w_ref, h_ref, s_ref):
    w = w_ref[...]                                      # (Fin, 2*Fout) bf16
    bg = a_ref.shape[0]
    for g in range(bg):                                 # static, fully unrolled
        a = a_ref[g]                                    # (N, N) bf16
        xw = jnp.dot(x_ref[g], w, preferred_element_type=jnp.float32)   # (N, 2Fout)
        h = jnp.maximum(
            jnp.dot(a, xw.astype(jnp.bfloat16),
                    preferred_element_type=jnp.float32), 0.0)
        h_ref[g] = h
        ah = jnp.dot(a, h.astype(jnp.bfloat16),
                     preferred_element_type=jnp.float32)
        s_ref[g] = jnp.sum(jnp.abs(h - ah), axis=-1)[None, :]           # (1, N)


def gcn_block_score(a_norm, x, w_cat):
    """a_norm: (G, N, N) f32, x: (G, N, Fin) f32, w_cat: (Fin, 2*Fout) f32.
    Returns h (G, N, 2*Fout) f32 and score (G, N) f32."""
    G, N, Fin = x.shape
    F2 = w_cat.shape[1]
    bg = _pick_graphs_per_block(G, N, Fin, F2)

    # bf16 inputs halve HBM traffic / vreg footprint; accumulation stays f32.
    a16 = a_norm.astype(jnp.bfloat16)
    x16 = x.astype(jnp.bfloat16)
    w16 = w_cat.astype(jnp.bfloat16)

    h, s = pl.pallas_call(
        _gcn_block_score_kernel,
        out_shape=(jax.ShapeDtypeStruct((G, N, F2), jnp.float32),
                   jax.ShapeDtypeStruct((G, 1, N), jnp.float32)),
        grid=(G // bg,),
        in_specs=[
            pl.BlockSpec((bg, N, N), lambda g: (g, 0, 0)),
            pl.BlockSpec((bg, N, Fin), lambda g: (g, 0, 0)),
            pl.BlockSpec((Fin, F2), lambda g: (0, 0)),   # weight block constant
        ],
        out_specs=(pl.BlockSpec((bg, N, F2), lambda g: (g, 0, 0)),
                   pl.BlockSpec((bg, 1, N), lambda g: (g, 0, 0))),
        compiler_params=pltpu.CompilerParams(
            dimension_semantics=("parallel",),
            vmem_limit_bytes=_VMEM_LIMIT_BYTES),
    )(a16, x16, w16)
    return h, s[:, 0, :]


# ----------------------------------------------------------------------------
# Kernel 2: MLP head: features = relu(relu(x W1 + b1) W2 + b2); x_lo = softmax(features)
# ----------------------------------------------------------------------------
def _mlp_head_kernel(x_ref, w1_ref, b1_ref, w2_ref, b2_ref, feat_ref, lo_ref):
    h = jnp.dot(x_ref[...], w1_ref[...], preferred_element_type=jnp.float32) + b1_ref[...]
    h = jnp.maximum(h, 0.0)
    f = jnp.dot(h, w2_ref[...], preferred_element_type=jnp.float32) + b2_ref[...]
    f = jnp.maximum(f, 0.0)
    feat_ref[...] = f
    m = jnp.max(f, axis=-1, keepdims=True)
    e = jnp.exp(f - m)
    inv = pl.reciprocal(jnp.sum(e, axis=-1, keepdims=True), approx=True)  # EUP slot
    lo_ref[...] = e * inv


def mlp_head(x, w1, b1, w2, b2):
    G, Din = x.shape
    H1, H2 = w1.shape[1], w2.shape[1]
    Gp = max(8, ((G + 7) // 8) * 8)            # pad rows to a sublane multiple
    xp = jnp.zeros((Gp, Din), jnp.float32).at[:G].set(x)

    feats, lo = pl.pallas_call(
        _mlp_head_kernel,
        out_shape=(jax.ShapeDtypeStruct((Gp, H2), jnp.float32),
                   jax.ShapeDtypeStruct((Gp, H2), jnp.float32)),
        grid=(1,),
        in_specs=[
            pl.BlockSpec((Gp, Din), lambda i: (0, 0)),
            pl.BlockSpec((Din, H1), lambda i: (0, 0)),
            pl.BlockSpec((1, H1), lambda i: (0, 0)),
            pl.BlockSpec((H1, H2), lambda i: (0, 0)),
            pl.BlockSpec((1, H2), lambda i: (0, 0)),
        ],
        out_specs=(pl.BlockSpec((Gp, H2), lambda i: (0, 0)),
                   pl.BlockSpec((Gp, H2), lambda i: (0, 0))),
        compiler_params=pltpu.CompilerParams(vmem_limit_bytes=_VMEM_LIMIT_BYTES),
    )(xp, w1, b1, w2, b2)
    return feats[:G], lo[:G]


# ----------------------------------------------------------------------------
# JAX glue: adjacency normalization, top-k pooling (gather), readout, forward.
# ----------------------------------------------------------------------------
def normalize_adj(a_raw):
    """Symmetric GCN normalization with self loops: D^-1/2 (A + I) D^-1/2."""
    N = a_raw.shape[-1]
    a = a_raw + jnp.eye(N, dtype=a_raw.dtype)[None]
    d = jnp.sum(a, axis=-1)
    dinv = 1.0 / jnp.sqrt(jnp.maximum(d, 1e-12))
    return a * dinv[:, :, None] * dinv[:, None, :]


def topk_pool(h, a_raw, score, ratio):
    """Top-k node selection by the (Pallas-computed) information score."""
    G, N, _ = h.shape
    k = math.ceil(ratio * N)
    _, idx = jax.lax.top_k(score, k)                  # (G, k)
    idx = jnp.sort(idx, axis=-1)
    h_p = jnp.take_along_axis(h, idx[:, :, None], axis=1)
    a_p = jnp.take_along_axis(a_raw, idx[:, :, None], axis=1)
    a_p = jnp.take_along_axis(a_p, idx[:, None, :], axis=2)
    return h_p, a_p


def readout(x):
    """cat[gmp, gap] per graph — tiny, left to XLA so it fuses with the gather."""
    return jnp.concatenate([jnp.max(x, axis=1), jnp.mean(x, axis=1)], axis=-1)


def ddbraingnn_forward(params, x, a_raw, *, pooling_ratio, dim2, dim3):
    G = x.shape[0]

    # stage 1: relu(gcn1) || relu(gcnsp1), fused with the pool-1 information score
    a1 = normalize_adj(a_raw)
    h, s1 = gcn_block_score(a1, x, params["w1_cat"])            # (G, N, 2*dim2), (G, N)
    h_p1, a_raw1 = topk_pool(h, a_raw, s1, pooling_ratio)
    x1 = readout(h_p1)                                          # (G, 4*dim2)

    # stage 2: relu(gcn2) || relu(gcnsp2), fused with the pool-2 information score
    a2 = normalize_adj(a_raw1)
    h2, s2 = gcn_block_score(a2, h_p1, params["w2_cat"])        # (G, N1, 2*dim2), (G, N1)
    h_p2, _ = topk_pool(h2, a_raw1, s2, pooling_ratio)
    x2 = readout(h_p2)                                          # (G, 4*dim2)

    # x.view(num_graphs, dim3 * out_dim2 * 2) and cat([x, x1, x2], dim=1)
    flat = h_p2.reshape(G, dim3 * dim2 * 2)
    feat_in = jnp.concatenate([flat, x1, x2], axis=1)

    features, x_lo = mlp_head(feat_in, params["lin1_w"], params["lin1_b"],
                              params["lin2_w"], params["lin2_b"])
    return x_lo, features


# ----------------------------------------------------------------------------
# Deterministic parameter init + example run
# ----------------------------------------------------------------------------
def glorot(key, shape):
    fan_in, fan_out = shape
    lim = math.sqrt(6.0 / (fan_in + fan_out))
    return jax.random.uniform(key, shape, jnp.float32, -lim, lim)


if __name__ == "__main__":
    # small, forward-consistent shapes (nodes-per-graph plays the role of the 111 ROIs)
    G, N = 2, 16                 # num_graphs, nodes per graph
    dim1, dim2 = 16, 8           # in feature dim, GCN output dim
    pooling_ratio = 0.5
    nhid = 32
    dim3 = math.ceil(pooling_ratio * math.ceil(pooling_ratio * N))   # nodes after 2 pools

    key = jax.random.PRNGKey(0)
    kx, ka, k0, k1, k2, k3, k4, k5 = jax.random.split(key, 8)

    x = jax.random.normal(kx, (G, N, dim1), jnp.float32)
    # random undirected adjacency (no self loops)
    r = jax.random.uniform(ka, (G, N, N))
    a_raw = (((r + jnp.swapaxes(r, 1, 2)) * 0.5) > 0.6).astype(jnp.float32)
    a_raw = a_raw * (1.0 - jnp.eye(N, dtype=jnp.float32)[None])

    din = dim3 * 2 * dim2 + 4 * dim2 + 4 * dim2   # actual cat([x, x1, x2]) width
    gcn1_w, gcnsp1_w = glorot(k0, (dim1, dim2)), glorot(k1, (dim1, dim2))
    gcn2_w, gcnsp2_w = glorot(k2, (2 * dim2, dim2)), glorot(k3, (2 * dim2, dim2))
    params = {
        # Wm || Wp merged on the host: one MXU push per stage instead of two.
        "w1_cat": jnp.concatenate([gcn1_w, gcnsp1_w], axis=1),   # (dim1, 2*dim2)
        "w2_cat": jnp.concatenate([gcn2_w, gcnsp2_w], axis=1),   # (2*dim2, 2*dim2)
        "lin1_w": glorot(k4, (din, nhid)),
        "lin1_b": jnp.zeros((1, nhid), jnp.float32),
        "lin2_w": glorot(k5, (nhid, nhid // 2)),
        "lin2_b": jnp.zeros((1, nhid // 2), jnp.float32),
    }

    forward = jax.jit(ddbraingnn_forward,
                      static_argnames=("pooling_ratio", "dim2", "dim3"))
    x_lo, features = forward(params, x, a_raw,
                             pooling_ratio=pooling_ratio, dim2=dim2, dim3=dim3)
    jax.block_until_ready((x_lo, features))
    assert x_lo.shape == (G, nhid // 2) and features.shape == (G, nhid // 2)
    assert bool(jnp.all(jnp.isfinite(x_lo))) and bool(jnp.all(jnp.isfinite(features)))
    print("KERNEL_OK")
</pallas_src>

<mosaic_0001>
module attributes {stable_mosaic.version = 11 : i64} {
  func.func @_gcn_block_score_kernel(%arg0: i32, %arg1: memref<1x16x16xbf16, #tpu.memory_space<vmem>>, %arg2: memref<1x16x16xbf16, #tpu.memory_space<vmem>>, %arg3: memref<16x16xbf16, #tpu.memory_space<vmem>>, %arg4: memref<1x16x16xf32, #tpu.memory_space<vmem>>, %arg5: memref<1x1x16xf32, #tpu.memory_space<vmem>>) attributes {dimension_semantics = [#tpu.dimension_semantics<parallel>], iteration_bounds = array<i64: 2>, scalar_prefetch = 0 : i64, scratch_operands = 0 : i64, tpu.core_type = #tpu.core_type<tc>, window_params = [{transform_indices = @transform_0, window_bounds = array<i64: 1, 16, 16>}, {transform_indices = @transform_1, window_bounds = array<i64: 1, 16, 16>}, {pipeline_mode = #tpu.pipeline_mode<synchronous>, transform_indices = @transform_2, window_bounds = array<i64: 16, 16>}, {transform_indices = @transform_3, window_bounds = array<i64: 1, 16, 16>}, {transform_indices = @transform_4, window_bounds = array<i64: 1, 1, 16>}]} {
    %c0 = arith.constant 0 : index
    %c0_0 = arith.constant 0 : index
    %0 = vector.load %arg3[%c0, %c0_0] : memref<16x16xbf16, #tpu.memory_space<vmem>>, vector<16x16xbf16>
    %c0_1 = arith.constant 0 : index
    %c0_2 = arith.constant 0 : index
    %c0_3 = arith.constant 0 : index
    %1 = vector.load %arg1[%c0_1, %c0_2, %c0_3] : memref<1x16x16xbf16, #tpu.memory_space<vmem>>, vector<1x16x16xbf16>
    %2 = vector.shape_cast %1 : vector<1x16x16xbf16> to vector<16x16xbf16>
    %c0_4 = arith.constant 0 : index
    %c0_5 = arith.constant 0 : index
    %c0_6 = arith.constant 0 : index
    %3 = vector.load %arg2[%c0_4, %c0_5, %c0_6] : memref<1x16x16xbf16, #tpu.memory_space<vmem>>, vector<1x16x16xbf16>
    %4 = vector.shape_cast %3 : vector<1x16x16xbf16> to vector<16x16xbf16>
    %cst = arith.constant dense<0.000000e+00> : vector<16x16xf32>
    %5 = tpu.matmul %4, %0, %cst {dimension_numbers = #tpu.dot_dimension_numbers<[1], [0], [0], [1], [0, 0, 1, 1], [], []>} : vector<16x16xbf16>, vector<16x16xbf16>, vector<16x16xf32> -> vector<16x16xf32>
    %6 = arith.truncf %5 : vector<16x16xf32> to vector<16x16xbf16>
    %cst_7 = arith.constant dense<0.000000e+00> : vector<16x16xf32>
    %7 = tpu.matmul %2, %6, %cst_7 {dimension_numbers = #tpu.dot_dimension_numbers<[1], [0], [0], [1], [0, 0, 1, 1], [], []>} : vector<16x16xbf16>, vector<16x16xbf16>, vector<16x16xf32> -> vector<16x16xf32>
    %cst_8 = arith.constant 0.000000e+00 : f32
    %8 = vector.broadcast %cst_8 : f32 to vector<16x16xf32>
    %9 = arith.maximumf %7, %8 : vector<16x16xf32>
    %c0_9 = arith.constant 0 : index
    %c0_10 = arith.constant 0 : index
    %c0_11 = arith.constant 0 : index
    %10 = vector.load %arg4[%c0_9, %c0_10, %c0_11] : memref<1x16x16xf32, #tpu.memory_space<vmem>>, vector<1x16x16xf32>
    %11 = vector.shape_cast %10 : vector<1x16x16xf32> to vector<16x16xf32>
    %12 = vector.shape_cast %9 : vector<16x16xf32> to vector<1x16x16xf32>
    tpu.vector_store %arg4[%c0_9, %c0_10, %c0_11], %12 {strides = array<i32>} : memref<1x16x16xf32, #tpu.memory_space<vmem>>, vector<1x16x16xf32>,
    %13 = arith.truncf %9 : vector<16x16xf32> to vector<16x16xbf16>
    %cst_12 = arith.constant dense<0.000000e+00> : vector<16x16xf32>
    %14 = tpu.matmul %2, %13, %cst_12 {dimension_numbers = #tpu.dot_dimension_numbers<[1], [0], [0], [1], [0, 0, 1, 1], [], []>} : vector<16x16xbf16>, vector<16x16xbf16>, vector<16x16xf32> -> vector<16x16xf32>
    %15 = arith.subf %9, %14 : vector<16x16xf32>
    %16 = math.absf %15 : vector<16x16xf32>
    %cst_13 = arith.constant dense<0.000000e+00> : vector<16xf32>
    %17 = vector.multi_reduction <add>, %16, %cst_13 [1] : vector<16x16xf32> to vector<16xf32>
    %18 = vector.shape_cast %17 : vector<16xf32> to vector<1x16xf32>
    %c0_14 = arith.constant 0 : index
    %c0_15 = arith.constant 0 : index
    %c0_16 = arith.constant 0 : index
    %19 = vector.load %arg5[%c0_14, %c0_15, %c0_16] : memref<1x1x16xf32, #tpu.memory_space<vmem>>, vector<1x1x16xf32>
    %20 = vector.shape_cast %19 : vector<1x1x16xf32> to vector<1x16xf32>
    %21 = vector.shape_cast %18 : vector<1x16xf32> to vector<1x1x16xf32>
    tpu.vector_store %arg5[%c0_14, %c0_15, %c0_16], %21 {strides = array<i32>} : memref<1x1x16xf32, #tpu.memory_space<vmem>>, vector<1x1x16xf32>,
    return
  }
  func.func @transform_0(%arg0: i32) -> (i32, i32, i32) {
    %c0_i32 = arith.constant 0 : i32
    %c0_i32_0 = arith.constant 0 : i32
    %c0_i32_1 = arith.constant 0 : i32
    return %arg0, %c0_i32, %c0_i32_0 : i32, i32, i32
  }
  func.func @transform_1(%arg0: i32) -> (i32, i32, i32) {
    %c0_i32 = arith.constant 0 : i32
    %c0_i32_0 = arith.constant 0 : i32
    %c0_i32_1 = arith.constant 0 : i32
    return %arg0, %c0_i32, %c0_i32_0 : i32, i32, i32
  }
  func.func @transform_2(%arg0: i32) -> (i32, i32) {
    %c0_i32 = arith.constant 0 : i32
    %c0_i32_0 = arith.constant 0 : i32
    %c0_i32_1 = arith.constant 0 : i32
    return %c0_i32, %c0_i32_0 : i32, i32
  }
  func.func @transform_3(%arg0: i32) -> (i32, i32, i32) {
    %c0_i32 = arith.constant 0 : i32
    %c0_i32_0 = arith.constant 0 : i32
    %c0_i32_1 = arith.constant 0 : i32
    return %arg0, %c0_i32, %c0_i32_0 : i32, i32, i32
  }
  func.func @transform_4(%arg0: i32) -> (i32, i32, i32) {
    %c0_i32 = arith.constant 0 : i32
    %c0_i32_0 = arith.constant 0 : i32
    %c0_i32_1 = arith.constant 0 : i32
    return %arg0, %c0_i32, %c0_i32_0 : i32, i32, i32
  }
}

module attributes {stable_mosaic.version = 11 : i64} {
  func.func @_gcn_block_score_kernel(%arg0: i32, %arg1: memref<1x8x8xbf16, #tpu.memory_space<vmem>>, %arg2: memref<1x8x16xbf16, #tpu.memory_space<vmem>>, %arg3: memref<16x16xbf16, #tpu.memory_space<vmem>>, %arg4: memref<1x8x16xf32, #tpu.memory_space<vmem>>, %arg5: memref<1x1x8xf32, #tpu.memory_space<vmem>>) attributes {dimension_semantics = [#tpu.dimension_semantics<parallel>], iteration_bounds = array<i64: 2>, scalar_prefetch = 0 : i64, scratch_operands = 0 : i64, tpu.core_type = #tpu.core_type<tc>, window_params = [{transform_indices = @transform_0, window_bounds = array<i64: 1, 8, 8>}, {transform_indices = @transform_1, window_bounds = array<i64: 1, 8, 16>}, {pipeline_mode = #tpu.pipeline_mode<synchronous>, transform_indices = @transform_2, window_bounds = array<i64: 16, 16>}, {transform_indices = @transform_3, window_bounds = array<i64: 1, 8, 16>}, {transform_indices = @transform_4, window_bounds = array<i64: 1, 1, 8>}]} {
    %c0 = arith.constant 0 : index
    %c0_0 = arith.constant 0 : index
    %0 = vector.load %arg3[%c0, %c0_0] : memref<16x16xbf16, #tpu.memory_space<vmem>>, vector<16x16xbf16>
    %c0_1 = arith.constant 0 : index
    %c0_2 = arith.constant 0 : index
    %c0_3 = arith.constant 0 : index
    %1 = vector.load %arg1[%c0_1, %c0_2, %c0_3] : memref<1x8x8xbf16, #tpu.memory_space<vmem>>, vector<1x8x8xbf16>
    %2 = vector.shape_cast %1 : vector<1x8x8xbf16> to vector<8x8xbf16>
    %c0_4 = arith.constant 0 : index
    %c0_5 = arith.constant 0 : index
    %c0_6 = arith.constant 0 : index
    %3 = vector.load %arg2[%c0_4, %c0_5, %c0_6] : memref<1x8x16xbf16, #tpu.memory_space<vmem>>, vector<1x8x16xbf16>
    %4 = vector.shape_cast %3 : vector<1x8x16xbf16> to vector<8x16xbf16>
    %cst = arith.constant dense<0.000000e+00> : vector<8x16xf32>
    %5 = tpu.matmul %4, %0, %cst {dimension_numbers = #tpu.dot_dimension_numbers<[1], [0], [0], [1], [0, 0, 1, 1], [], []>} : vector<8x16xbf16>, vector<16x16xbf16>, vector<8x16xf32> -> vector<8x16xf32>
    %6 = arith.truncf %5 : vector<8x16xf32> to vector<8x16xbf16>
    %cst_7 = arith.constant dense<0.000000e+00> : vector<8x16xf32>
    %7 = tpu.matmul %2, %6, %cst_7 {dimension_numbers = #tpu.dot_dimension_numbers<[1], [0], [0], [1], [0, 0, 1, 1], [], []>} : vector<8x8xbf16>, vector<8x16xbf16>, vector<8x16xf32> -> vector<8x16xf32>
    %cst_8 = arith.constant 0.000000e+00 : f32
    %8 = vector.broadcast %cst_8 : f32 to vector<8x16xf32>
    %9 = arith.maximumf %7, %8 : vector<8x16xf32>
    %c0_9 = arith.constant 0 : index
    %c0_10 = arith.constant 0 : index
    %c0_11 = arith.constant 0 : index
    %10 = vector.load %arg4[%c0_9, %c0_10, %c0_11] : memref<1x8x16xf32, #tpu.memory_space<vmem>>, vector<1x8x16xf32>
    %11 = vector.shape_cast %10 : vector<1x8x16xf32> to vector<8x16xf32>
    %12 = vector.shape_cast %9 : vector<8x16xf32> to vector<1x8x16xf32>
    tpu.vector_store %arg4[%c0_9, %c0_10, %c0_11], %12 {strides = array<i32>} : memref<1x8x16xf32, #tpu.memory_space<vmem>>, vector<1x8x16xf32>,
    %13 = arith.truncf %9 : vector<8x16xf32> to vector<8x16xbf16>
    %cst_12 = arith.constant dense<0.000000e+00> : vector<8x16xf32>
    %14 = tpu.matmul %2, %13, %cst_12 {dimension_numbers = #tpu.dot_dimension_numbers<[1], [0], [0], [1], [0, 0, 1, 1], [], []>} : vector<8x8xbf16>, vector<8x16xbf16>, vector<8x16xf32> -> vector<8x16xf32>
    %15 = arith.subf %9, %14 : vector<8x16xf32>
    %16 = math.absf %15 : vector<8x16xf32>
    %cst_13 = arith.constant dense<0.000000e+00> : vector<8xf32>
    %17 = vector.multi_reduction <add>, %16, %cst_13 [1] : vector<8x16xf32> to vector<8xf32>
    %18 = vector.shape_cast %17 : vector<8xf32> to vector<1x8xf32>
    %c0_14 = arith.constant 0 : index
    %c0_15 = arith.constant 0 : index
    %c0_16 = arith.constant 0 : index
    %19 = vector.load %arg5[%c0_14, %c0_15, %c0_16] : memref<1x1x8xf32, #tpu.memory_space<vmem>>, vector<1x1x8xf32>
    %20 = vector.shape_cast %19 : vector<1x1x8xf32> to vector<1x8xf32>
    %21 = vector.shape_cast %18 : vector<1x8xf32> to vector<1x1x8xf32>
    tpu.vector_store %arg5[%c0_14, %c0_15, %c0_16], %21 {strides = array<i32>} : memref<1x1x8xf32, #tpu.memory_space<vmem>>, vector<1x1x8xf32>,
    return
  }
  func.func @transform_0(%arg0: i32) -> (i32, i32, i32) {
    %c0_i32 = arith.constant 0 : i32
    %c0_i32_0 = arith.constant 0 : i32
    %c0_i32_1 = arith.constant 0 : i32
    return %arg0, %c0_i32, %c0_i32_0 : i32, i32, i32
  }
  func.func @transform_1(%arg0: i32) -> (i32, i32, i32) {
    %c0_i32 = arith.constant 0 : i32
    %c0_i32_0 = arith.constant 0 : i32
    %c0_i32_1 = arith.constant 0 : i32
    return %arg0, %c0_i32, %c0_i32_0 : i32, i32, i32
  }
  func.func @transform_2(%arg0: i32) -> (i32, i32) {
    %c0_i32 = arith.constant 0 : i32
    %c0_i32_0 = arith.constant 0 : i32
    %c0_i32_1 = arith.constant 0 : i32
    return %c0_i32, %c0_i32_0 : i32, i32
  }
  func.func @transform_3(%arg0: i32) -> (i32, i32, i32) {
    %c0_i32 = arith.constant 0 : i32
    %c0_i32_0 = arith.constant 0 : i32
    %c0_i32_1 = arith.constant 0 : i32
    return %arg0, %c0_i32, %c0_i32_0 : i32, i32, i32
  }
  func.func @transform_4(%arg0: i32) -> (i32, i32, i32) {
    %c0_i32 = arith.constant 0 : i32
    %c0_i32_0 = arith.constant 0 : i32
    %c0_i32_1 = arith.constant 0 : i32
    return %arg0, %c0_i32, %c0_i32_0 : i32, i32, i32
  }
}

module attributes {stable_mosaic.version = 11 : i64} {
  func.func @_mlp_head_kernel(%arg0: i32, %arg1: memref<8x128xf32, #tpu.memory_space<vmem>>, %arg2: memref<128x32xf32, #tpu.memory_space<vmem>>, %arg3: memref<1x32xf32, #tpu.memory_space<vmem>>, %arg4: memref<32x16xf32, #tpu.memory_space<vmem>>, %arg5: memref<1x16xf32, #tpu.memory_space<vmem>>, %arg6: memref<8x16xf32, #tpu.memory_space<vmem>>, %arg7: memref<8x16xf32, #tpu.memory_space<vmem>>) attributes {dimension_semantics = [#tpu.dimension_semantics<arbitrary>], iteration_bounds = array<i64: 1>, scalar_prefetch = 0 : i64, scratch_operands = 0 : i64, tpu.core_type = #tpu.core_type<tc>, window_params = [{pipeline_mode = #tpu.pipeline_mode<synchronous>, transform_indices = @transform_0, window_bounds = array<i64: 8, 128>}, {pipeline_mode = #tpu.pipeline_mode<synchronous>, transform_indices = @transform_1, window_bounds = array<i64: 128, 32>}, {pipeline_mode = #tpu.pipeline_mode<synchronous>, transform_indices = @transform_2, window_bounds = array<i64: 1, 32>}, {pipeline_mode = #tpu.pipeline_mode<synchronous>, transform_indices = @transform_3, window_bounds = array<i64: 32, 16>}, {pipeline_mode = #tpu.pipeline_mode<synchronous>, transform_indices = @transform_4, window_bounds = array<i64: 1, 16>}, {pipeline_mode = #tpu.pipeline_mode<synchronous>, transform_indices = @transform_5, window_bounds = array<i64: 8, 16>}, {pipeline_mode = #tpu.pipeline_mode<synchronous>, transform_indices = @transform_6, window_bounds = array<i64: 8, 16>}]} {
    %c0 = arith.constant 0 : index
    %c0_0 = arith.constant 0 : index
    %0 = vector.load %arg1[%c0, %c0_0] : memref<8x128xf32, #tpu.memory_space<vmem>>, vector<8x128xf32>
    %c0_1 = arith.constant 0 : index
    %c0_2 = arith.constant 0 : index
    %1 = vector.load %arg2[%c0_1, %c0_2] : memref<128x32xf32, #tpu.memory_space<vmem>>, vector<128x32xf32>
    %cst = arith.constant dense<0.000000e+00> : vector<8x32xf32>
    %2 = tpu.matmul %0, %1, %cst {dimension_numbers = #tpu.dot_dimension_numbers<[1], [0], [0], [1], [0, 0, 1, 1], [], []>} : vector<8x128xf32>, vector<128x32xf32>, vector<8x32xf32> -> vector<8x32xf32>
    %c0_3 = arith.constant 0 : index
    %c0_4 = arith.constant 0 : index
    %3 = vector.load %arg3[%c0_3, %c0_4] : memref<1x32xf32, #tpu.memory_space<vmem>>, vector<1x32xf32>
    %4 = vector.broadcast %3 : vector<1x32xf32> to vector<8x32xf32>
    %5 = arith.addf %2, %4 : vector<8x32xf32>
    %cst_5 = arith.constant 0.000000e+00 : f32
    %6 = vector.broadcast %cst_5 : f32 to vector<8x32xf32>
    %7 = arith.maximumf %5, %6 : vector<8x32xf32>
    %c0_6 = arith.constant 0 : index
    %c0_7 = arith.constant 0 : index
    %8 = vector.load %arg4[%c0_6, %c0_7] : memref<32x16xf32, #tpu.memory_space<vmem>>, vector<32x16xf32>
    %cst_8 = arith.constant dense<0.000000e+00> : vector<8x16xf32>
    %9 = tpu.matmul %7, %8, %cst_8 {dimension_numbers = #tpu.dot_dimension_numbers<[1], [0], [0], [1], [0, 0, 1, 1], [], []>} : vector<8x32xf32>, vector<32x16xf32>, vector<8x16xf32> -> vector<8x16xf32>
    %c0_9 = arith.constant 0 : index
    %c0_10 = arith.constant 0 : index
    %10 = vector.load %arg5[%c0_9, %c0_10] : memref<1x16xf32, #tpu.memory_space<vmem>>, vector<1x16xf32>
    %11 = vector.broadcast %10 : vector<1x16xf32> to vector<8x16xf32>
    %12 = arith.addf %9, %11 : vector<8x16xf32>
    %cst_11 = arith.constant 0.000000e+00 : f32
    %13 = vector.broadcast %cst_11 : f32 to vector<8x16xf32>
    %14 = arith.maximumf %12, %13 : vector<8x16xf32>
    %c0_12 = arith.constant 0 : index
    %c0_13 = arith.constant 0 : index
    %15 = vector.load %arg6[%c0_12, %c0_13] : memref<8x16xf32, #tpu.memory_space<vmem>>, vector<8x16xf32>
    tpu.vector_store %arg6[%c0_12, %c0_13], %14 {strides = array<i32>} : memref<8x16xf32, #tpu.memory_space<vmem>>, vector<8x16xf32>,
    %cst_14 = arith.constant dense<0xFF800000> : vector<8xf32>
    %16 = vector.multi_reduction <maximumf>, %14, %cst_14 [1] : vector<8x16xf32> to vector<8xf32>
    %17 = vector.shape_cast %16 : vector<8xf32> to vector<8x1xf32>
    %18 = vector.broadcast %17 : vector<8x1xf32> to vector<8x16xf32>
    %19 = arith.subf %14, %18 : vector<8x16xf32>
    %20 = math.exp %19 : vector<8x16xf32>
    %cst_15 = arith.constant dense<0.000000e+00> : vector<8xf32>
    %21 = vector.multi_reduction <add>, %20, %cst_15 [1] : vector<8x16xf32> to vector<8xf32>
    %22 = vector.shape_cast %21 : vector<8xf32> to vector<8x1xf32>
    %23 = tpu.reciprocal %22 {approx = true} : vector<8x1xf32> -> vector<8x1xf32>
    %24 = vector.broadcast %23 : vector<8x1xf32> to vector<8x16xf32>
    %25 = arith.mulf %20, %24 : vector<8x16xf32>
    %c0_16 = arith.constant 0 : index
    %c0_17 = arith.constant 0 : index
    %26 = vector.load %arg7[%c0_16, %c0_17] : memref<8x16xf32, #tpu.memory_space<vmem>>, vector<8x16xf32>
    tpu.vector_store %arg7[%c0_16, %c0_17], %25 {strides = array<i32>} : memref<8x16xf32, #tpu.memory_space<vmem>>, vector<8x16xf32>,
    return
  }
  func.func @transform_0(%arg0: i32) -> (i32, i32) {
    %c0_i32 = arith.constant 0 : i32
    %c0_i32_0 = arith.constant 0 : i32
    %c0_i32_1 = arith.constant 0 : i32
    return %c0_i32, %c0_i32_0 : i32, i32
  }
  func.func @transform_1(%arg0: i32) -> (i32, i32) {
    %c0_i32 = arith.constant 0 : i32
    %c0_i32_0 = arith.constant 0 : i32
    %c0_i32_1 = arith.constant 0 : i32
    return %c0_i32, %c0_i32_0 : i32, i32
  }
  func.func @transform_2(%arg0: i32) -> (i32, i32) {
    %c0_i32 = arith.constant 0 : i32
    %c0_i32_0 = arith.constant 0 : i32
    %c0_i32_1 = arith.constant 0 : i32
    return %c0_i32, %c0_i32_0 : i32, i32
  }
  func.func @transform_3(%arg0: i32) -> (i32, i32) {
    %c0_i32 = arith.constant 0 : i32
    %c0_i32_0 = arith.constant 0 : i32
    %c0_i32_1 = arith.constant 0 : i32
    return %c0_i32, %c0_i32_0 : i32, i32
  }
  func.func @transform_4(%arg0: i32) -> (i32, i32) {
    %c0_i32 = arith.constant 0 : i32
    %c0_i32_0 = arith.constant 0 : i32
    %c0_i32_1 = arith.constant 0 : i32
    return %c0_i32, %c0_i32_0 : i32, i32
  }
  func.func @transform_5(%arg0: i32) -> (i32, i32) {
    %c0_i32 = arith.constant 0 : i32
    %c0_i32_0 = arith.constant 0 : i32
    %c0_i32_1 = arith.constant 0 : i32
    return %c0_i32, %c0_i32_0 : i32, i32
  }
  func.func @transform_6(%arg0: i32) -> (i32, i32) {
    %c0_i32 = arith.constant 0 : i32
    %c0_i32_0 = arith.constant 0 : i32
    %c0_i32_1 = arith.constant 0 : i32
    return %c0_i32, %c0_i32_0 : i32, i32
  }
}

</mosaic_0001>

<bundles_post_ra>
// kernel: ddbraingnn_forward.3
= control target key start
LH: loop header
LB: loop body
LE: loop exit
PB: predicated region body
PF: predicated region fallthrough
CT: control target
= control target key end

     0   :  { %s494_s15 = smov 0   ;;  %s532_s0 = inlined_call_operand.vmem [shape: bf16[2,16,16], index: 0, kind: input, shape index: {}]   ;;  %s533_s1 = inlined_call_operand.vmem [shape: bf16[2,16,16], index: 1, kind: input, shape index: {}]   ;;  %s534_s2 = inlined_call_operand.vmem [shape: bf16[16,16], index: 2, kind: input, shape index: {}]   ;;  %s535_s3 = inlined_call_operand.vmem [shape: f32[2,16,16], index: 3, kind: output, shape index: {0}]   ;;  %s536_s4 = inlined_call_operand.vmem [shape: f32[2,1,16], index: 4, kind: output, shape index: {1}]  }
   0x1 LB: > { %s419_s16 = sadd.s32 4294967295, %s467_s15   ;;  %p423_p0 = scmp.ge.s32.totalorder %s467_s15, 1  ;;  %s467_s15 = sphi %s494_s15, %s15_s15  }
   0x2   : > { %p175_p1 = scmp.lt.s32.totalorder %s467_s15, 3 }
   0x4   : > { %p176_p2 = pnand %p423_p0, %p175_p1 }
   0x5   : > { %p209_p3 = scmp.lt.s32.totalorder (!%p176_p2), %s419_s16, 1 }
   0x6   : > { %179 = sbr.rel (%p176_p2) target bundleno = 560 (0x230), region = 32 }
   0xb   : > { %v450_v0 = vld [vmem:[%s534_s2] sm:$0xff]  ;;  %s538_s16 = smov (!%p209_p3, %s419_s16), 1  ;;  %vm245_vm0 = vcmask 130048   ;;  %v317_v19 = vlaneseq  ;;  %vm322_vm1 = vcmask 130112   ;;  %vm325_vm2 = vcmask 122880  }
   0xc   : > { %256 = vmatpush.bf16.msra.mxu0 %v450_v0  ;;  %s447_s19 = sshll.u32 %s538_s16, 3  ;;  %s449_s26 = sshll.u32 %s538_s16, 4 }
   0xd   : > { %s218_s22 = scalar_lea.vmem %s533_s1, %s447_s19  ;;  %s213_s25 = scalar_lea.vmem %s532_s0, %s447_s19  ;;  %v318_v21 = vand.u32 127, %v317_v19 }
   0xe   : > { %v452_v1 = vld [vmem:[%s218_s22] sm:$0xff]  ;;  %s223_s29 = scalar_lea.vmem %s535_s3, %s449_s26  ;;  %s226_s6 = scalar_lea.vmem %s536_s4, %s538_s16 }
   0xf   : > { %438 = vmatmul.msk.bf16.vlgmr.msra.gmra.mxu0 %vm245_vm0, %v452_v1  ;;  %v451_v5 = vld [vmem:[%s213_s25] sm:$0xff]  ;;  %v320_v22 = vadd.s32 4294967288, %v318_v21 }
  0x8c   : > { %v258_v2 = vpop.f32.mrf.mxu0 }
  0x94   : > { %v260_v3 = vpop.f32.mrf.mxu0 }
  0x95   : > { %v263_v4 = vpack.c.bf16 %v260_v3, %v258_v2 }
  0x97   : > { %279 = vmatpush.bf16.msra.mxu1 %v263_v4 }
  0x9a   : > { %443 = vmatmul.msk.bf16.vlgmr.msra.gmra.mxu1 %vm245_vm0, %v451_v5 }
 0x117   : > { %v281_v6 = vpop.f32.mrf.mxu1 }
 0x118   : > { %v286_v7 = vmax.f32 %v281_v6, 0.0 }
 0x11a   : > { %288 = vst.msk [vmem:[%s223_s29] sm:$0xff] %vm245_vm0, %v286_v7 }
 0x11f   : > { %v283_v8 = vpop.f32.mrf.mxu1 }
 0x120   : > { %v287_v9 = vmax.f32 %v283_v8, 0.0 }
 0x122   : > { %289 = vst.msk [vmem:[%s223_s29 + $0x8] sm:$0xff] %vm245_vm0, %v287_v9  ;;  %v290_v10 = vpack.c.bf16 %v287_v9, %v286_v7 }
 0x124   : > { %298 = vmatpush.bf16.msra.mxu2 %v290_v10 }
 0x127   : > { %444 = vmatmul.msk.bf16.vlgmr.msra.gmra.mxu2 %vm245_vm0, %v451_v5 }
 0x1aa   : > { %v300_v11 = vpop.f32.mrf.mxu2 }
 0x1ab   : > { %v305_v12 = vsub.f32 %v286_v7, %v300_v11 }
 0x1ad   : > { %v307_v13 = vand.u32 2147483647, %v305_v12 }
 0x1af   : > { %v309_v14 = vsel %vm245_vm0, %v307_v13, 0.0 }
 0x1b0   : > { %310 = vadd.xlane.f32.xlu0 %v309_v14 }
 0x1b2   : > { %v302_v15 = vpop.f32.mrf.mxu2 }
 0x1b3   : > { %v306_v16 = vsub.f32 %v287_v9, %v302_v15 }
 0x1b5   : > { %v308_v17 = vand.u32 2147483647, %v306_v16 }
 0x1b7   : > { %v312_v18 = vsel %vm245_vm0, %v308_v17, 0.0 }
 0x1b8   : > { %313 = vadd.xlane.f32.xlu0 %v312_v18 }
 0x223   : > { %v311_v20 = vpop.xlane.xlu0 %310 }
 0x224   : > { %v319_v24 = vperm.slane %v311_v20, %v318_v21 }
 0x22b   : > { %v314_v23 = vpop.xlane.xlu0 %313 }
 0x22c   : > { %v321_v25 = vperm.slane %v314_v23, %v320_v22 }
 0x22e   : > { %v323_v26 = vsel %vm322_vm1, %v321_v25, %v319_v24 }
 0x22f   : > { %326 = vst.msk [vmem:[%s226_s6] sm:$0x1] %vm325_vm2, %v323_v26 }
 0x230 PF: > { %s15_s15 = sadd.s32 1, %s467_s15  }
 0x231   : > { %p12_p4 = scmp.ge.s32.totalorder %s15_s15, 4  }
 0x233   :  { %14 = sbr.rel (!%p12_p4) target bundleno = 1 (0x1), region = 77 }

// kernel: ddbraingnn_forward.4
= control target key start
LH: loop header
LB: loop body
LE: loop exit
PB: predicated region body
PF: predicated region fallthrough
CT: control target
= control target key end

     0   :  { %s449_s15 = smov 0   ;;  %s483_s0 = inlined_call_operand.vmem [shape: bf16[2,8,8], index: 0, kind: input, shape index: {}]   ;;  %s484_s1 = inlined_call_operand.vmem [shape: bf16[2,8,16], index: 1, kind: input, shape index: {}]   ;;  %s485_s2 = inlined_call_operand.vmem [shape: bf16[16,16], index: 2, kind: input, shape index: {}]   ;;  %s486_s3 = inlined_call_operand.vmem [shape: f32[2,8,16], index: 3, kind: output, shape index: {0}]   ;;  %s487_s4 = inlined_call_operand.vmem [shape: f32[2,1,8], index: 4, kind: output, shape index: {1}]  }
   0x1 LB: > { %s390_s16 = sadd.s32 4294967295, %s422_s15   ;;  %p394_p0 = scmp.ge.s32.totalorder %s422_s15, 1  ;;  %s422_s15 = sphi %s449_s15, %s15_s15  }
   0x2   : > { %p173_p1 = scmp.lt.s32.totalorder %s422_s15, 3 }
   0x4   : > { %p174_p2 = pnand %p394_p0, %p173_p1 }
   0x5   : > { %p204_p3 = scmp.lt.s32.totalorder (!%p174_p2), %s390_s16, 1 }
   0x6   : > { %177 = sbr.rel (%p174_p2) target bundleno = 537 (0x219), region = 32 }
   0xb   : > { %v407_v0 = vld [vmem:[%s485_s2] sm:$0xff]  ;;  %s489_s16 = smov (!%p204_p3, %s390_s16), 1  ;;  %vm230_vm0 = vcmask 130048   ;;  %vm252_vm1 = vcmask 1043456   ;;  %vm248_vm2 = vcmask 64512   ;;  %v294_v17 = vlaneseq }
   0xc   : > { %241 = vmatpush.bf16.msra.mxu0 %v407_v0  ;;  %s395_s19 = sshll.u32 %s489_s16, 2  ;;  %s397_s26 = sshll.u32 %s489_s16, 3  ;;  %vm298_vm3 = vcmask 57344  }
   0xd   : > { %s211_s22 = scalar_lea.vmem %s484_s1, %s395_s19  ;;  %s207_s25 = scalar_lea.vmem %s483_s0, %s395_s19  ;;  %v295_v18 = vand.u32 127, %v294_v17 }
   0xe   : > { %v223_v1 = vld [vmem:[%s211_s22] sm:$0xf]  ;;  %s215_s29 = scalar_lea.vmem %s486_s3, %s397_s26  ;;  %s218_s6 = scalar_lea.vmem %s487_s4, %s489_s16 }
   0xf   : > { %402 = vmatmul.msk.bf16.vlgmr.msra.gmra.mxu0 %vm230_vm0, %v223_v1  ;;  %v222_v5 = vld [vmem:[%s207_s25] sm:$0xf] }
  0x8c   : > { %v243_v2 = vpop.f32.mrf.mxu0 }
  0x8d   : > { %v247_v3 = vpack.c.bf16 %v243_v2, %v243_v2 }
  0x8f   : > { %v254_v4 = vsel %vm252_vm1, %v247_v3, 0 }
  0x90   : > { %263 = vmatpush.bf16.msra.mxu1 %v254_v4 }
  0x93   : > { %403 = vmatmul.msk.bf16.vlgmr.msra.gmra.mxu1 %vm248_vm2, %v222_v5 }
  0x94   : > { %v245_v6 = vpop.f32.mrf.mxu0 }
 0x110   : > { %v265_v7 = vpop.f32.mrf.mxu1 }
 0x111   : > { %v269_v8 = vmax.f32 %v265_v7, 0.0 }
 0x113   : > { %270 = vst.msk [vmem:[%s215_s29] sm:$0xff] %vm230_vm0, %v269_v8  ;;  %v271_v9 = vpack.c.bf16 %v269_v8, %v269_v8 }
 0x115   : > { %v273_v10 = vsel %vm252_vm1, %v271_v9, 0 }
 0x116   : > { %282 = vmatpush.bf16.msra.mxu2 %v273_v10 }
 0x118   : > { %v267_v11 = vpop.f32.mrf.mxu1 }
 0x119   : > { %404 = vmatmul.msk.bf16.vlgmr.msra.gmra.mxu2 %vm248_vm2, %v222_v5 }
 0x19c   : > { %v284_v12 = vpop.f32.mrf.mxu2 }
 0x19d   : > { %v288_v13 = vsub.f32 %v269_v8, %v284_v12 }
 0x19f   : > { %v289_v14 = vand.u32 2147483647, %v288_v13 }
 0x1a1   : > { %v290_v15 = vsel %vm230_vm0, %v289_v14, 0.0 }
 0x1a2   : > { %291 = vadd.xlane.f32.xlu0 %v290_v15 }
 0x1a4   : > { %v286_v16 = vpop.f32.mrf.mxu2 }
 0x215   : > { %v292_v19 = vpop.xlane.xlu0 %291 }
 0x216   : > { %v296_v20 = vperm.slane %v292_v19, %v295_v18 }
 0x218   : > { %299 = vst.msk [vmem:[%s218_s6] sm:$0x1] %vm298_vm3, %v296_v20 }
 0x219 PF: > { %s15_s15 = sadd.s32 1, %s422_s15  }
 0x21a   : > { %p12_p4 = scmp.ge.s32.totalorder %s15_s15, 4  }
 0x21c   :  { %14 = sbr.rel (!%p12_p4) target bundleno = 1 (0x1), region = 77 }

// kernel: ddbraingnn_forward.5
= control target key start
LH: loop header
LB: loop body
LE: loop exit
PB: predicated region body
PF: predicated region fallthrough
CT: control target
= control target key end

     0   :  { %vm72_vm0 = vcmask 261120   ;;  %vm97_vm1 = vcmask 130048   ;;  %s240_s1 = inlined_call_operand.vmem [shape: f32[128,32], index: 1, kind: input, shape index: {}]   ;;  %s241_s3 = inlined_call_operand.vmem [shape: f32[32,16], index: 3, kind: input, shape index: {}]   ;;  %s242_s2 = inlined_call_operand.vmem [shape: f32[1,32], index: 2, kind: input, shape index: {}]   ;;  %s243_s0 = inlined_call_operand.vmem [shape: f32[8,128], index: 0, kind: input, shape index: {}]   ;;  %s244_s4 = inlined_call_operand.vmem [shape: f32[1,16], index: 4, kind: input, shape index: {}]   ;;  %s245_s5 = inlined_call_operand.vmem [shape: f32[8,16], index: 5, kind: output, shape index: {0}]   ;;  %s246_s6 = inlined_call_operand.vmem [shape: f32[8,16], index: 6, kind: output, shape index: {1}]  }
   0x1   :  { %v38_v0 = vld [vmem:[%s240_s1 + $0x78] sm:$0xff]  ;;  %v37_v1 = vld [vmem:[%s240_s1 + $0x70] sm:$0xff]  ;;  %v36_v2 = vld [vmem:[%s240_s1 + $0x68] sm:$0xff] }
   0x2   :  { %43 = vmatpush.msra.mxu0 %v38_v0  ;;  %v35_v3 = vld [vmem:[%s240_s1 + $0x60] sm:$0xff]  ;;  %v67_v4 = vld [vmem:[%s241_s3 + $0x18] sm:$0xff]  ;;  %v33_v6 = vld [vmem:[%s240_s1 + $0x50] sm:$0xff] }
   0x3   :  { %v34_v5 = vld [vmem:[%s240_s1 + $0x58] sm:$0xff]  ;;  %88 = vmatpush.msra.mxu1 %v67_v4  ;;  %v32_v7 = vld [vmem:[%s240_s1 + $0x48] sm:$0xff]  ;;  %v31_v8 = vld [vmem:[%s240_s1 + $0x40] sm:$0xff] }
   0x4   :  { %44 = vmatpush.msra.mxu0 %v37_v1  ;;  %v30_v9 = vld [vmem:[%s240_s1 + $0x38] sm:$0xff]  ;;  %v29_v10 = vld [vmem:[%s240_s1 + $0x30] sm:$0xff]  ;;  %v28_v11 = vld [vmem:[%s240_s1 + $0x28] sm:$0xff] }
   0x5   :  { %v27_v12 = vld [vmem:[%s240_s1 + $0x20] sm:$0xff]  ;;  %v26_v13 = vld [vmem:[%s240_s1 + $0x18] sm:$0xff]  ;;  %v25_v14 = vld [vmem:[%s240_s1 + $0x10] sm:$0xff] }
   0x6   :  { %45 = vmatpush.msra.mxu0 %v36_v2  ;;  %v24_v15 = vld [vmem:[%s240_s1 + $0x8] sm:$0xff]  ;;  %v23_v16 = vld [vmem:[%s240_s1] sm:$0xff]  ;;  %v66_v18 = vld [vmem:[%s241_s3 + $0x10] sm:$0xff] }
   0x7   :  { %v22_v17 = vld [vmem:[%s243_s0] sm:$0xff]  ;;  %89 = vmatpush.msra.mxu1 %v66_v18  ;;  %v65_v19 = vld [vmem:[%s241_s3 + $0x8] sm:$0xff] }
   0x8   :  { %46 = vmatpush.msra.mxu0 %v35_v3  ;;  %v64_v20 = vld [vmem:[%s241_s3] sm:$0xff] }
   0x9   :  { %90 = vmatpush.msra.mxu1 %v65_v19  ;;  %v120_v21 = vld [vmem:[%s242_s2] ss:$0 sm:$0xff] }
   0xa   :  { %47 = vmatpush.msra.mxu0 %v34_v5  ;;  %v121_v25 = vld [vmem:[%s244_s4] ss:$0 sm:$0xff] }
   0xb   :  { %91 = vmatpush.msra.mxu1 %v64_v20 }
   0xc   :  { %48 = vmatpush.msra.mxu0 %v33_v6 }
   0xe   :  { %49 = vmatpush.msra.mxu0 %v32_v7 }
  0x10   :  { %50 = vmatpush.msra.mxu0 %v31_v8 }
  0x12   :  { %51 = vmatpush.msra.mxu0 %v30_v9 }
  0x14   :  { %52 = vmatpush.msra.mxu0 %v29_v10 }
  0x16   :  { %53 = vmatpush.msra.mxu0 %v28_v11 }
  0x18   :  { %54 = vmatpush.msra.mxu0 %v27_v12 }
  0x1a   :  { %55 = vmatpush.msra.mxu0 %v26_v13 }
  0x1c   :  { %56 = vmatpush.msra.mxu0 %v25_v14 }
  0x1e   :  { %57 = vmatpush.msra.mxu0 %v24_v15 }
  0x20   :  { %58 = vmatpush.msra.mxu0 %v23_v16 }
  0x21   :  { %59 = vmatmul.f32.vlgmr.msra.gmra.mxu0 %v22_v17 }
  0x9e   :  { %v60_v22 = vpop.f32.mrf.mxu0 }
  0x9f   :  { %v61_v23 = vadd.f32 %v120_v21, %v60_v22 }
  0xa1   :  { %v63_v24 = vmax.f32 %v61_v23, 0.0 }
  0xa3   :  { %119 = vmatmul.msk.f32.vlgmr.msra.gmra.mxu1 %vm72_vm0, %v63_v24 }
 0x120   :  { %v93_v26 = vpop.f32.mrf.mxu1 }
 0x121   :  { %v94_v27 = vadd.f32 %v121_v25, %v93_v26 }
 0x123   :  { %v96_v28 = vmax.f32 %v94_v27, 0.0 }
 0x125   :  { %v99_v29 = vsel %vm97_vm1, %v96_v28, -inf  ;;  %98 = vst.msk [vmem:[%s245_s5] sm:$0xff] %vm97_vm1, %v96_v28 }
 0x126   :  { %100 = vmax.xlane.f32.xlu0 %v99_v29 }
 0x199   :  { %v101_v30 = vpop.xlane.xlu0 %100 }
 0x19a   :  { %v102_v31 = vsub.f32 %v96_v28, %v101_v30 }
 0x19c   :  { %v103_v32 = vmul.f32 1.442695, %v102_v31 }
 0x19e   :  { %122 = vpow2.f32 %v103_v32 }
 0x1a4   :  { %v123_v33 = vpop.eup %122 }
 0x1a5   :  { %v105_v34 = vsel %vm97_vm1, %v123_v33, 0.0 }
 0x1a6   :  { %106 = vadd.xlane.f32.xlu0 %v105_v34 }
 0x219   :  { %v107_v35 = vpop.xlane.xlu0 %106 }
 0x21a   :  { %124 = vrcp.f32 %v107_v35 }
 0x220   :  { %v125_v36 = vpop.eup %124 }
 0x221   :  { %v109_v37 = vmul.f32 %v125_v36, %v123_v33 }
 0x223   :  { %110 = vst.msk [vmem:[%s246_s6] sm:$0xff] %vm97_vm1, %v109_v37 }

</bundles_post_ra>
